<compile_context>
chip_gen: v5e
topology: v5e:2x2
jax: 0.10.0
libtpu: 0.0.40
codegen_flags: <defaults>
</compile_context>

<pallas_src>
import jax
import jax.numpy as jnp
from jax.experimental import pallas as pl
from jax.experimental.pallas import tpu as pltpu

PARAMS_DIM = {"betas": 10, "global_orient": 3, "transl": 3, "body_pose": 69}
_FRAME_DIM = (PARAMS_DIM["global_orient"]
              + PARAMS_DIM["transl"]
              + PARAMS_DIM["body_pose"])          # 75
_BETAS_OFF = _FRAME_DIM                           # betas live at cols [75, 85)
_SLAB_DIM = 128                                   # lane-dense width
_ROWS_PER_STEP = 8                                # TB: one (8,128) vreg per step


def fuse_body_model_params(params):
    """Build the fused lane-dense lookup table ONCE (cache it across forwards).

    params: dict of raw embedding weights
        'betas'         (1, 10)   'global_orient' (F, 3)
        'transl'        (F, 3)    'body_pose'     (F, 69)
    Returns an (F, 128) float32 table.
    """
    go, tr, bp = params["global_orient"], params["transl"], params["body_pose"]
    assert go.shape[1] == PARAMS_DIM["global_orient"]
    assert tr.shape[1] == PARAMS_DIM["transl"]
    assert bp.shape[1] == PARAMS_DIM["body_pose"]
    assert params["betas"].shape == (1, PARAMS_DIM["betas"])
    num_frames = go.shape[0]

    frames = jnp.concatenate([go, tr, bp], axis=1).astype(jnp.float32)   # (F, 75)
    betas = jnp.broadcast_to(params["betas"].astype(jnp.float32),
                             (num_frames, PARAMS_DIM["betas"]))          # (F, 10)
    pad = jnp.zeros(
        (num_frames, _SLAB_DIM - _FRAME_DIM - PARAMS_DIM["betas"]), jnp.float32)
    return jnp.concatenate([frames, betas, pad], axis=1)                 # (F, 128)


def body_model_params_forward(frame_ids, fused_table, *, rows_per_step=_ROWS_PER_STEP):
    """JAX/Pallas equivalent of BodyModelParams.forward.

    frame_ids:   (B,) integer array.
    fused_table: (F, 128) float32 from fuse_body_model_params (built once).
    Returns dict of (B, dim) float32 arrays matching the PyTorch module.
    """
    B = frame_ids.shape[0]
    F = fused_table.shape[0]
    TB = rows_per_step

    # PyTorch nn.Embedding raises on out-of-range ids; we clamp instead so the
    # data-dependent DMA can never read out of bounds (documented divergence).
    ids = jnp.clip(frame_ids.astype(jnp.int32), 0, F - 1)

    # Pad batch to a multiple of TB (padded rows gather frame 0, sliced off).
    b_pad = pl.cdiv(B, TB) * TB
    if b_pad != B:
        ids = jnp.concatenate([ids, jnp.zeros((b_pad - B,), jnp.int32)])
    num_steps = b_pad // TB

    def kernel(ids_ref, table_hbm, out_ref, sems):
        # ids_ref  : (b_pad,) int32 in SMEM (scalar prefetch)
        # table_hbm: (F, 128) f32 raw HBM ref (memory_space=pl.ANY)
        # out_ref  : (TB, 128) f32 VMEM output block for this step
        # sems     : (TB,) DMA semaphores
        base = pl.program_id(0) * TB
        copies = []
        # Issue all TB row-gather DMAs, then wait: keeps TB DMAs in flight so
        # per-row HBM latency overlaps instead of serializing.
        for r in range(TB):                       # static unroll
            idx = ids_ref[base + r]
            cp = pltpu.make_async_copy(
                table_hbm.at[pl.ds(idx, 1), :],   # (1, 128) HBM row
                out_ref.at[pl.ds(r, 1), :],       # (1, 128) VMEM row
                sems.at[r])
            cp.start()
            copies.append(cp)
        for cp in copies:
            cp.wait()

    slab = pl.pallas_call(
        kernel,
        out_shape=jax.ShapeDtypeStruct((b_pad, _SLAB_DIM), jnp.float32),
        grid_spec=pltpu.PrefetchScalarGridSpec(
            num_scalar_prefetch=1,
            grid=(num_steps,),
            in_specs=[pl.BlockSpec(memory_space=pl.ANY)],   # table stays in HBM
            out_specs=pl.BlockSpec((TB, _SLAB_DIM),
                                   lambda i, ids_ref: (i, 0)),
            scratch_shapes=[pltpu.SemaphoreType.DMA((TB,))],
        ),
        compiler_params=pltpu.CompilerParams(
            # Each step writes a distinct output block -> safe to shard the
            # batch loop across v7x's 2 TensorCores; neutral on v5e/v6e.
            dimension_semantics=("parallel",),
        ),
    )(ids, fused_table)

    slab = slab[:B]                               # drop batch padding
    go_d, tr_d = PARAMS_DIM["global_orient"], PARAMS_DIM["transl"]
    return {
        "betas": slab[:, _BETAS_OFF:_BETAS_OFF + PARAMS_DIM["betas"]],
        "global_orient": slab[:, :go_d],
        "transl": slab[:, go_d:go_d + tr_d],
        "body_pose": slab[:, go_d + tr_d:_FRAME_DIM],
    }


def init_body_model_params(num_frames, key):
    """Parameter init. The PyTorch module fills the weights with zeros; we use
    small random values so the gather is actually exercised by the test."""
    k0, k1, k2, k3 = jax.random.split(key, 4)
    return {
        "betas": jax.random.normal(k0, (1, PARAMS_DIM["betas"]), jnp.float32),
        "global_orient": jax.random.normal(
            k1, (num_frames, PARAMS_DIM["global_orient"]), jnp.float32),
        "transl": jax.random.normal(
            k2, (num_frames, PARAMS_DIM["transl"]), jnp.float32),
        "body_pose": jax.random.normal(
            k3, (num_frames, PARAMS_DIM["body_pose"]), jnp.float32),
    }
# TODO(synk): init_parameters / set_requires_grad are parameter-management
# (requires_grad bookkeeping) with no forward compute; not represented here.
# The fused table is an inference-time cache: it must be rebuilt if the raw
# embedding weights are updated, and no VJP flows through it.


if __name__ == "__main__":
    num_frames = 16
    batch = 20          # not a multiple of 8 -> exercises padding + multi-step

    key = jax.random.PRNGKey(0)
    kp, ki = jax.random.split(key)
    params = init_body_model_params(num_frames, kp)
    frame_ids = jax.random.randint(ki, (batch,), 0, num_frames, dtype=jnp.int32)

    # Fused table is built once (init/cache), NOT per forward call.
    fused_table = jax.block_until_ready(fuse_body_model_params(params))

    out = body_model_params_forward(frame_ids, fused_table)
    out = jax.tree_util.tree_map(jax.block_until_ready, out)

    # Pure-JAX reference (embedding lookups).
    ref = {
        "betas": jnp.take(params["betas"], jnp.zeros_like(frame_ids), axis=0),
        "global_orient": jnp.take(params["global_orient"], frame_ids, axis=0),
        "transl": jnp.take(params["transl"], frame_ids, axis=0),
        "body_pose": jnp.take(params["body_pose"], frame_ids, axis=0),
    }
    for name in ("betas", "global_orient", "transl", "body_pose"):
        assert out[name].shape == (batch, PARAMS_DIM[name]), (name, out[name].shape)
        assert jnp.allclose(out[name], ref[name], atol=1e-6), name

    print("KERNEL_OK")
</pallas_src>

<mosaic_0001>
module attributes {stable_mosaic.version = 11 : i64} {
  func.func @kernel(%arg0: i32, %arg1: memref<24xi32, #tpu.memory_space<smem>>, %arg2: memref<16x128xf32, #tpu.memory_space<any>>, %arg3: memref<8x128xf32, #tpu.memory_space<vmem>>, %arg4: memref<8x!tpu.dma_semaphore, #tpu.memory_space<semaphore_mem>>) attributes {dimension_semantics = [#tpu.dimension_semantics<parallel>], iteration_bounds = array<i64: 3>, scalar_prefetch = 1 : i64, scratch_operands = 1 : i64, tpu.core_type = #tpu.core_type<tc>, window_params = [{}, {transform_indices = @transform_1, window_bounds = array<i64: 8, 128>}]} {
    %c8_i32 = arith.constant 8 : i32
    %0 = arith.muli %arg0, %c8_i32 : i32
    %c0_i32 = arith.constant 0 : i32
    %1 = arith.addi %0, %c0_i32 : i32
    %2 = arith.index_cast %1 : i32 to index
    %3 = memref.load %arg1[%2] : memref<24xi32, #tpu.memory_space<smem>>
    %c0_i32_0 = arith.constant 0 : i32
    %c0_i32_1 = arith.constant 0 : i32
    %4 = tpu.memref_slice %arg2[%3, %c0_i32_1] : memref<16x128xf32, #tpu.memory_space<any>> -> memref<1x128xf32, #tpu.memory_space<any>>
    %c0_i32_2 = arith.constant 0 : i32
    %c0_i32_3 = arith.constant 0 : i32
    %5 = tpu.memref_slice %arg3[%c0_i32_2, %c0_i32_3] : memref<8x128xf32, #tpu.memory_space<vmem>> -> memref<1x128xf32, #tpu.memory_space<vmem>>
    %6 = tpu.memref_slice %arg4[%c0_i32_0] : memref<8x!tpu.dma_semaphore, #tpu.memory_space<semaphore_mem>> -> memref<1x!tpu.dma_semaphore, #tpu.memory_space<semaphore_mem>>
    %7 = tpu.memref_squeeze %6 : memref<1x!tpu.dma_semaphore, #tpu.memory_space<semaphore_mem>> -> memref<!tpu.dma_semaphore, #tpu.memory_space<semaphore_mem>>
    tpu.enqueue_dma source(%4 : memref<1x128xf32, #tpu.memory_space<any>>) target(%5 : memref<1x128xf32, #tpu.memory_space<vmem>>) target_semaphore(%7 : memref<!tpu.dma_semaphore, #tpu.memory_space<semaphore_mem>>)
    %c1_i32 = arith.constant 1 : i32
    %8 = arith.addi %0, %c1_i32 : i32
    %9 = arith.index_cast %8 : i32 to index
    %10 = memref.load %arg1[%9] : memref<24xi32, #tpu.memory_space<smem>>
    %c1_i32_4 = arith.constant 1 : i32
    %c0_i32_5 = arith.constant 0 : i32
    %11 = tpu.memref_slice %arg2[%10, %c0_i32_5] : memref<16x128xf32, #tpu.memory_space<any>> -> memref<1x128xf32, #tpu.memory_space<any>>
    %c1_i32_6 = arith.constant 1 : i32
    %c0_i32_7 = arith.constant 0 : i32
    %12 = tpu.memref_slice %arg3[%c1_i32_6, %c0_i32_7] : memref<8x128xf32, #tpu.memory_space<vmem>> -> memref<1x128xf32, #tpu.memory_space<vmem>>
    %13 = tpu.memref_slice %arg4[%c1_i32_4] : memref<8x!tpu.dma_semaphore, #tpu.memory_space<semaphore_mem>> -> memref<1x!tpu.dma_semaphore, #tpu.memory_space<semaphore_mem>>
    %14 = tpu.memref_squeeze %13 : memref<1x!tpu.dma_semaphore, #tpu.memory_space<semaphore_mem>> -> memref<!tpu.dma_semaphore, #tpu.memory_space<semaphore_mem>>
    tpu.enqueue_dma source(%11 : memref<1x128xf32, #tpu.memory_space<any>>) target(%12 : memref<1x128xf32, #tpu.memory_space<vmem>>) target_semaphore(%14 : memref<!tpu.dma_semaphore, #tpu.memory_space<semaphore_mem>>)
    %c2_i32 = arith.constant 2 : i32
    %15 = arith.addi %0, %c2_i32 : i32
    %16 = arith.index_cast %15 : i32 to index
    %17 = memref.load %arg1[%16] : memref<24xi32, #tpu.memory_space<smem>>
    %c2_i32_8 = arith.constant 2 : i32
    %c0_i32_9 = arith.constant 0 : i32
    %18 = tpu.memref_slice %arg2[%17, %c0_i32_9] : memref<16x128xf32, #tpu.memory_space<any>> -> memref<1x128xf32, #tpu.memory_space<any>>
    %c2_i32_10 = arith.constant 2 : i32
    %c0_i32_11 = arith.constant 0 : i32
    %19 = tpu.memref_slice %arg3[%c2_i32_10, %c0_i32_11] : memref<8x128xf32, #tpu.memory_space<vmem>> -> memref<1x128xf32, #tpu.memory_space<vmem>>
    %20 = tpu.memref_slice %arg4[%c2_i32_8] : memref<8x!tpu.dma_semaphore, #tpu.memory_space<semaphore_mem>> -> memref<1x!tpu.dma_semaphore, #tpu.memory_space<semaphore_mem>>
    %21 = tpu.memref_squeeze %20 : memref<1x!tpu.dma_semaphore, #tpu.memory_space<semaphore_mem>> -> memref<!tpu.dma_semaphore, #tpu.memory_space<semaphore_mem>>
    tpu.enqueue_dma source(%18 : memref<1x128xf32, #tpu.memory_space<any>>) target(%19 : memref<1x128xf32, #tpu.memory_space<vmem>>) target_semaphore(%21 : memref<!tpu.dma_semaphore, #tpu.memory_space<semaphore_mem>>)
    %c3_i32 = arith.constant 3 : i32
    %22 = arith.addi %0, %c3_i32 : i32
    %23 = arith.index_cast %22 : i32 to index
    %24 = memref.load %arg1[%23] : memref<24xi32, #tpu.memory_space<smem>>
    %c3_i32_12 = arith.constant 3 : i32
    %c0_i32_13 = arith.constant 0 : i32
    %25 = tpu.memref_slice %arg2[%24, %c0_i32_13] : memref<16x128xf32, #tpu.memory_space<any>> -> memref<1x128xf32, #tpu.memory_space<any>>
    %c3_i32_14 = arith.constant 3 : i32
    %c0_i32_15 = arith.constant 0 : i32
    %26 = tpu.memref_slice %arg3[%c3_i32_14, %c0_i32_15] : memref<8x128xf32, #tpu.memory_space<vmem>> -> memref<1x128xf32, #tpu.memory_space<vmem>>
    %27 = tpu.memref_slice %arg4[%c3_i32_12] : memref<8x!tpu.dma_semaphore, #tpu.memory_space<semaphore_mem>> -> memref<1x!tpu.dma_semaphore, #tpu.memory_space<semaphore_mem>>
    %28 = tpu.memref_squeeze %27 : memref<1x!tpu.dma_semaphore, #tpu.memory_space<semaphore_mem>> -> memref<!tpu.dma_semaphore, #tpu.memory_space<semaphore_mem>>
    tpu.enqueue_dma source(%25 : memref<1x128xf32, #tpu.memory_space<any>>) target(%26 : memref<1x128xf32, #tpu.memory_space<vmem>>) target_semaphore(%28 : memref<!tpu.dma_semaphore, #tpu.memory_space<semaphore_mem>>)
    %c4_i32 = arith.constant 4 : i32
    %29 = arith.addi %0, %c4_i32 : i32
    %30 = arith.index_cast %29 : i32 to index
    %31 = memref.load %arg1[%30] : memref<24xi32, #tpu.memory_space<smem>>
    %c4_i32_16 = arith.constant 4 : i32
    %c0_i32_17 = arith.constant 0 : i32
    %32 = tpu.memref_slice %arg2[%31, %c0_i32_17] : memref<16x128xf32, #tpu.memory_space<any>> -> memref<1x128xf32, #tpu.memory_space<any>>
    %c4_i32_18 = arith.constant 4 : i32
    %c0_i32_19 = arith.constant 0 : i32
    %33 = tpu.memref_slice %arg3[%c4_i32_18, %c0_i32_19] : memref<8x128xf32, #tpu.memory_space<vmem>> -> memref<1x128xf32, #tpu.memory_space<vmem>>
    %34 = tpu.memref_slice %arg4[%c4_i32_16] : memref<8x!tpu.dma_semaphore, #tpu.memory_space<semaphore_mem>> -> memref<1x!tpu.dma_semaphore, #tpu.memory_space<semaphore_mem>>
    %35 = tpu.memref_squeeze %34 : memref<1x!tpu.dma_semaphore, #tpu.memory_space<semaphore_mem>> -> memref<!tpu.dma_semaphore, #tpu.memory_space<semaphore_mem>>
    tpu.enqueue_dma source(%32 : memref<1x128xf32, #tpu.memory_space<any>>) target(%33 : memref<1x128xf32, #tpu.memory_space<vmem>>) target_semaphore(%35 : memref<!tpu.dma_semaphore, #tpu.memory_space<semaphore_mem>>)
    %c5_i32 = arith.constant 5 : i32
    %36 = arith.addi %0, %c5_i32 : i32
    %37 = arith.index_cast %36 : i32 to index
    %38 = memref.load %arg1[%37] : memref<24xi32, #tpu.memory_space<smem>>
    %c5_i32_20 = arith.constant 5 : i32
    %c0_i32_21 = arith.constant 0 : i32
    %39 = tpu.memref_slice %arg2[%38, %c0_i32_21] : memref<16x128xf32, #tpu.memory_space<any>> -> memref<1x128xf32, #tpu.memory_space<any>>
    %c5_i32_22 = arith.constant 5 : i32
    %c0_i32_23 = arith.constant 0 : i32
    %40 = tpu.memref_slice %arg3[%c5_i32_22, %c0_i32_23] : memref<8x128xf32, #tpu.memory_space<vmem>> -> memref<1x128xf32, #tpu.memory_space<vmem>>
    %41 = tpu.memref_slice %arg4[%c5_i32_20] : memref<8x!tpu.dma_semaphore, #tpu.memory_space<semaphore_mem>> -> memref<1x!tpu.dma_semaphore, #tpu.memory_space<semaphore_mem>>
    %42 = tpu.memref_squeeze %41 : memref<1x!tpu.dma_semaphore, #tpu.memory_space<semaphore_mem>> -> memref<!tpu.dma_semaphore, #tpu.memory_space<semaphore_mem>>
    tpu.enqueue_dma source(%39 : memref<1x128xf32, #tpu.memory_space<any>>) target(%40 : memref<1x128xf32, #tpu.memory_space<vmem>>) target_semaphore(%42 : memref<!tpu.dma_semaphore, #tpu.memory_space<semaphore_mem>>)
    %c6_i32 = arith.constant 6 : i32
    %43 = arith.addi %0, %c6_i32 : i32
    %44 = arith.index_cast %43 : i32 to index
    %45 = memref.load %arg1[%44] : memref<24xi32, #tpu.memory_space<smem>>
    %c6_i32_24 = arith.constant 6 : i32
    %c0_i32_25 = arith.constant 0 : i32
    %46 = tpu.memref_slice %arg2[%45, %c0_i32_25] : memref<16x128xf32, #tpu.memory_space<any>> -> memref<1x128xf32, #tpu.memory_space<any>>
    %c6_i32_26 = arith.constant 6 : i32
    %c0_i32_27 = arith.constant 0 : i32
    %47 = tpu.memref_slice %arg3[%c6_i32_26, %c0_i32_27] : memref<8x128xf32, #tpu.memory_space<vmem>> -> memref<1x128xf32, #tpu.memory_space<vmem>>
    %48 = tpu.memref_slice %arg4[%c6_i32_24] : memref<8x!tpu.dma_semaphore, #tpu.memory_space<semaphore_mem>> -> memref<1x!tpu.dma_semaphore, #tpu.memory_space<semaphore_mem>>
    %49 = tpu.memref_squeeze %48 : memref<1x!tpu.dma_semaphore, #tpu.memory_space<semaphore_mem>> -> memref<!tpu.dma_semaphore, #tpu.memory_space<semaphore_mem>>
    tpu.enqueue_dma source(%46 : memref<1x128xf32, #tpu.memory_space<any>>) target(%47 : memref<1x128xf32, #tpu.memory_space<vmem>>) target_semaphore(%49 : memref<!tpu.dma_semaphore, #tpu.memory_space<semaphore_mem>>)
    %c7_i32 = arith.constant 7 : i32
    %50 = arith.addi %0, %c7_i32 : i32
    %51 = arith.index_cast %50 : i32 to index
    %52 = memref.load %arg1[%51] : memref<24xi32, #tpu.memory_space<smem>>
    %c7_i32_28 = arith.constant 7 : i32
    %c0_i32_29 = arith.constant 0 : i32
    %53 = tpu.memref_slice %arg2[%52, %c0_i32_29] : memref<16x128xf32, #tpu.memory_space<any>> -> memref<1x128xf32, #tpu.memory_space<any>>
    %c7_i32_30 = arith.constant 7 : i32
    %c0_i32_31 = arith.constant 0 : i32
    %54 = tpu.memref_slice %arg3[%c7_i32_30, %c0_i32_31] : memref<8x128xf32, #tpu.memory_space<vmem>> -> memref<1x128xf32, #tpu.memory_space<vmem>>
    %55 = tpu.memref_slice %arg4[%c7_i32_28] : memref<8x!tpu.dma_semaphore, #tpu.memory_space<semaphore_mem>> -> memref<1x!tpu.dma_semaphore, #tpu.memory_space<semaphore_mem>>
    %56 = tpu.memref_squeeze %55 : memref<1x!tpu.dma_semaphore, #tpu.memory_space<semaphore_mem>> -> memref<!tpu.dma_semaphore, #tpu.memory_space<semaphore_mem>>
    tpu.enqueue_dma source(%53 : memref<1x128xf32, #tpu.memory_space<any>>) target(%54 : memref<1x128xf32, #tpu.memory_space<vmem>>) target_semaphore(%56 : memref<!tpu.dma_semaphore, #tpu.memory_space<semaphore_mem>>)
    %c0_i32_32 = arith.constant 0 : i32
    %c0_i32_33 = arith.constant 0 : i32
    %57 = tpu.memref_slice %arg2[%3, %c0_i32_33] : memref<16x128xf32, #tpu.memory_space<any>> -> memref<1x128xf32, #tpu.memory_space<any>>
    %c0_i32_34 = arith.constant 0 : i32
    %c0_i32_35 = arith.constant 0 : i32
    %58 = tpu.memref_slice %arg3[%c0_i32_34, %c0_i32_35] : memref<8x128xf32, #tpu.memory_space<vmem>> -> memref<1x128xf32, #tpu.memory_space<vmem>>
    %59 = tpu.memref_slice %arg4[%c0_i32_32] : memref<8x!tpu.dma_semaphore, #tpu.memory_space<semaphore_mem>> -> memref<1x!tpu.dma_semaphore, #tpu.memory_space<semaphore_mem>>
    %60 = tpu.memref_squeeze %59 : memref<1x!tpu.dma_semaphore, #tpu.memory_space<semaphore_mem>> -> memref<!tpu.dma_semaphore, #tpu.memory_space<semaphore_mem>>
    tpu.wait_dma2 semaphore(%60 : memref<!tpu.dma_semaphore, #tpu.memory_space<semaphore_mem>>) src(%57 : memref<1x128xf32, #tpu.memory_space<any>>) dst(%58 : memref<1x128xf32, #tpu.memory_space<vmem>>)
    %c1_i32_36 = arith.constant 1 : i32
    %c0_i32_37 = arith.constant 0 : i32
    %61 = tpu.memref_slice %arg2[%10, %c0_i32_37] : memref<16x128xf32, #tpu.memory_space<any>> -> memref<1x128xf32, #tpu.memory_space<any>>
    %c1_i32_38 = arith.constant 1 : i32
    %c0_i32_39 = arith.constant 0 : i32
    %62 = tpu.memref_slice %arg3[%c1_i32_38, %c0_i32_39] : memref<8x128xf32, #tpu.memory_space<vmem>> -> memref<1x128xf32, #tpu.memory_space<vmem>>
    %63 = tpu.memref_slice %arg4[%c1_i32_36] : memref<8x!tpu.dma_semaphore, #tpu.memory_space<semaphore_mem>> -> memref<1x!tpu.dma_semaphore, #tpu.memory_space<semaphore_mem>>
    %64 = tpu.memref_squeeze %63 : memref<1x!tpu.dma_semaphore, #tpu.memory_space<semaphore_mem>> -> memref<!tpu.dma_semaphore, #tpu.memory_space<semaphore_mem>>
    tpu.wait_dma2 semaphore(%64 : memref<!tpu.dma_semaphore, #tpu.memory_space<semaphore_mem>>) src(%61 : memref<1x128xf32, #tpu.memory_space<any>>) dst(%62 : memref<1x128xf32, #tpu.memory_space<vmem>>)
    %c2_i32_40 = arith.constant 2 : i32
    %c0_i32_41 = arith.constant 0 : i32
    %65 = tpu.memref_slice %arg2[%17, %c0_i32_41] : memref<16x128xf32, #tpu.memory_space<any>> -> memref<1x128xf32, #tpu.memory_space<any>>
    %c2_i32_42 = arith.constant 2 : i32
    %c0_i32_43 = arith.constant 0 : i32
    %66 = tpu.memref_slice %arg3[%c2_i32_42, %c0_i32_43] : memref<8x128xf32, #tpu.memory_space<vmem>> -> memref<1x128xf32, #tpu.memory_space<vmem>>
    %67 = tpu.memref_slice %arg4[%c2_i32_40] : memref<8x!tpu.dma_semaphore, #tpu.memory_space<semaphore_mem>> -> memref<1x!tpu.dma_semaphore, #tpu.memory_space<semaphore_mem>>
    %68 = tpu.memref_squeeze %67 : memref<1x!tpu.dma_semaphore, #tpu.memory_space<semaphore_mem>> -> memref<!tpu.dma_semaphore, #tpu.memory_space<semaphore_mem>>
    tpu.wait_dma2 semaphore(%68 : memref<!tpu.dma_semaphore, #tpu.memory_space<semaphore_mem>>) src(%65 : memref<1x128xf32, #tpu.memory_space<any>>) dst(%66 : memref<1x128xf32, #tpu.memory_space<vmem>>)
    %c3_i32_44 = arith.constant 3 : i32
    %c0_i32_45 = arith.constant 0 : i32
    %69 = tpu.memref_slice %arg2[%24, %c0_i32_45] : memref<16x128xf32, #tpu.memory_space<any>> -> memref<1x128xf32, #tpu.memory_space<any>>
    %c3_i32_46 = arith.constant 3 : i32
    %c0_i32_47 = arith.constant 0 : i32
    %70 = tpu.memref_slice %arg3[%c3_i32_46, %c0_i32_47] : memref<8x128xf32, #tpu.memory_space<vmem>> -> memref<1x128xf32, #tpu.memory_space<vmem>>
    %71 = tpu.memref_slice %arg4[%c3_i32_44] : memref<8x!tpu.dma_semaphore, #tpu.memory_space<semaphore_mem>> -> memref<1x!tpu.dma_semaphore, #tpu.memory_space<semaphore_mem>>
    %72 = tpu.memref_squeeze %71 : memref<1x!tpu.dma_semaphore, #tpu.memory_space<semaphore_mem>> -> memref<!tpu.dma_semaphore, #tpu.memory_space<semaphore_mem>>
    tpu.wait_dma2 semaphore(%72 : memref<!tpu.dma_semaphore, #tpu.memory_space<semaphore_mem>>) src(%69 : memref<1x128xf32, #tpu.memory_space<any>>) dst(%70 : memref<1x128xf32, #tpu.memory_space<vmem>>)
    %c4_i32_48 = arith.constant 4 : i32
    %c0_i32_49 = arith.constant 0 : i32
    %73 = tpu.memref_slice %arg2[%31, %c0_i32_49] : memref<16x128xf32, #tpu.memory_space<any>> -> memref<1x128xf32, #tpu.memory_space<any>>
    %c4_i32_50 = arith.constant 4 : i32
    %c0_i32_51 = arith.constant 0 : i32
    %74 = tpu.memref_slice %arg3[%c4_i32_50, %c0_i32_51] : memref<8x128xf32, #tpu.memory_space<vmem>> -> memref<1x128xf32, #tpu.memory_space<vmem>>
    %75 = tpu.memref_slice %arg4[%c4_i32_48] : memref<8x!tpu.dma_semaphore, #tpu.memory_space<semaphore_mem>> -> memref<1x!tpu.dma_semaphore, #tpu.memory_space<semaphore_mem>>
    %76 = tpu.memref_squeeze %75 : memref<1x!tpu.dma_semaphore, #tpu.memory_space<semaphore_mem>> -> memref<!tpu.dma_semaphore, #tpu.memory_space<semaphore_mem>>
    tpu.wait_dma2 semaphore(%76 : memref<!tpu.dma_semaphore, #tpu.memory_space<semaphore_mem>>) src(%73 : memref<1x128xf32, #tpu.memory_space<any>>) dst(%74 : memref<1x128xf32, #tpu.memory_space<vmem>>)
    %c5_i32_52 = arith.constant 5 : i32
    %c0_i32_53 = arith.constant 0 : i32
    %77 = tpu.memref_slice %arg2[%38, %c0_i32_53] : memref<16x128xf32, #tpu.memory_space<any>> -> memref<1x128xf32, #tpu.memory_space<any>>
    %c5_i32_54 = arith.constant 5 : i32
    %c0_i32_55 = arith.constant 0 : i32
    %78 = tpu.memref_slice %arg3[%c5_i32_54, %c0_i32_55] : memref<8x128xf32, #tpu.memory_space<vmem>> -> memref<1x128xf32, #tpu.memory_space<vmem>>
    %79 = tpu.memref_slice %arg4[%c5_i32_52] : memref<8x!tpu.dma_semaphore, #tpu.memory_space<semaphore_mem>> -> memref<1x!tpu.dma_semaphore, #tpu.memory_space<semaphore_mem>>
    %80 = tpu.memref_squeeze %79 : memref<1x!tpu.dma_semaphore, #tpu.memory_space<semaphore_mem>> -> memref<!tpu.dma_semaphore, #tpu.memory_space<semaphore_mem>>
    tpu.wait_dma2 semaphore(%80 : memref<!tpu.dma_semaphore, #tpu.memory_space<semaphore_mem>>) src(%77 : memref<1x128xf32, #tpu.memory_space<any>>) dst(%78 : memref<1x128xf32, #tpu.memory_space<vmem>>)
    %c6_i32_56 = arith.constant 6 : i32
    %c0_i32_57 = arith.constant 0 : i32
    %81 = tpu.memref_slice %arg2[%45, %c0_i32_57] : memref<16x128xf32, #tpu.memory_space<any>> -> memref<1x128xf32, #tpu.memory_space<any>>
    %c6_i32_58 = arith.constant 6 : i32
    %c0_i32_59 = arith.constant 0 : i32
    %82 = tpu.memref_slice %arg3[%c6_i32_58, %c0_i32_59] : memref<8x128xf32, #tpu.memory_space<vmem>> -> memref<1x128xf32, #tpu.memory_space<vmem>>
    %83 = tpu.memref_slice %arg4[%c6_i32_56] : memref<8x!tpu.dma_semaphore, #tpu.memory_space<semaphore_mem>> -> memref<1x!tpu.dma_semaphore, #tpu.memory_space<semaphore_mem>>
    %84 = tpu.memref_squeeze %83 : memref<1x!tpu.dma_semaphore, #tpu.memory_space<semaphore_mem>> -> memref<!tpu.dma_semaphore, #tpu.memory_space<semaphore_mem>>
    tpu.wait_dma2 semaphore(%84 : memref<!tpu.dma_semaphore, #tpu.memory_space<semaphore_mem>>) src(%81 : memref<1x128xf32, #tpu.memory_space<any>>) dst(%82 : memref<1x128xf32, #tpu.memory_space<vmem>>)
    %c7_i32_60 = arith.constant 7 : i32
    %c0_i32_61 = arith.constant 0 : i32
    %85 = tpu.memref_slice %arg2[%52, %c0_i32_61] : memref<16x128xf32, #tpu.memory_space<any>> -> memref<1x128xf32, #tpu.memory_space<any>>
    %c7_i32_62 = arith.constant 7 : i32
    %c0_i32_63 = arith.constant 0 : i32
    %86 = tpu.memref_slice %arg3[%c7_i32_62, %c0_i32_63] : memref<8x128xf32, #tpu.memory_space<vmem>> -> memref<1x128xf32, #tpu.memory_space<vmem>>
    %87 = tpu.memref_slice %arg4[%c7_i32_60] : memref<8x!tpu.dma_semaphore, #tpu.memory_space<semaphore_mem>> -> memref<1x!tpu.dma_semaphore, #tpu.memory_space<semaphore_mem>>
    %88 = tpu.memref_squeeze %87 : memref<1x!tpu.dma_semaphore, #tpu.memory_space<semaphore_mem>> -> memref<!tpu.dma_semaphore, #tpu.memory_space<semaphore_mem>>
    tpu.wait_dma2 semaphore(%88 : memref<!tpu.dma_semaphore, #tpu.memory_space<semaphore_mem>>) src(%85 : memref<1x128xf32, #tpu.memory_space<any>>) dst(%86 : memref<1x128xf32, #tpu.memory_space<vmem>>)
    return
  }
  func.func @transform_1(%arg0: i32, %arg1: memref<24xi32, #tpu.memory_space<smem>>) -> (i32, i32) {
    %c0_i32 = arith.constant 0 : i32
    %c0_i32_0 = arith.constant 0 : i32
    return %arg0, %c0_i32 : i32, i32
  }
}

</mosaic_0001>

<bundles_post_ra>
// kernel: tpu_custom_call.1
= control target key start
LH: loop header
LB: loop body
LE: loop exit
PB: predicated region body
PF: predicated region fallthrough
CT: control target
= control target key end

     0   :  { %s751_s12 = smov [#allocation4]   ;;  %s1066_s0 = inlined_call_operand.hbm [shape: s32[24], index: 0, kind: input, shape index: {}]   ;;  %s1067_s1 = inlined_call_operand.hbm [shape: f32[16,128], index: 1, kind: input, shape index: {}]   ;;  %s1068_s2 = inlined_call_operand.hbm [shape: f32[24,128], index: 2, kind: output, shape index: {}]  }
   0x1   :  { %s8_s11 = sshll.u32 %s1066_s0, 4  ;;  %s9_s11 = int_to_ptr.hbm [resolvable:$true] %s8_s11 }
   0x2   :  { %11 = dma.hbm_to_smem %s9_s11, 16, %s751_s12, [#allocation3] }
   0x3   :  { %701 = dma.done.wait [#allocation3], 16 }
   0x4   :  { %702 = vsyncadd [#allocation3], 4294967280 }
   0x5   :  { %14 = sfence }
   0x6   :  { %15 = vsyncpa [#allocation6], 0 }
   0x7   :  { %17 = vsyncpa [#allocation6 + $0x1], 0  ;;  %s770_s13 = smov 0   ;;  %s772_s14 = smov 0  }
   0x8   :  { %s774_s15 = smov 0  }
   0x9 LB: > { %s337_s0 = sadd.s32 4294967295, %s749_s15   ;;  %s787_s16 = sadd.s32 1, %s749_s15   ;;  %s749_s15 = sphi %s774_s15, %s1076_s15   ;;  %s745_s14 = sphi %s772_s14, %s1075_s14   ;;  %s741_s13 = sphi %s770_s13, %s1074_s13  }
   0xa   : > { %s26_s17 = ssub.s32 %s749_s15, %s787_s16  ;;  %s29_s18 = sadd.s32 1, %s745_s14 }
   0xb   : > { %p27_p0 = scmp.eq.s32.totalorder %s26_s17, 0  ;;  %p338_p1 = scmp.ne.s32.totalorder %s26_s17, 0 }
   0xc   : > { %p33_p2 = scmp.eq.s32.totalorder %s749_s15, 2  ;;  %p38_p3 = scmp.ne.s32.totalorder %s745_s14, %s741_s13 }
   0xd   : > { %s796_s19 = scalar_select %p27_p0, %s745_s14, %s29_s18  }
   0xe   : > { %p798_p4 = por %p338_p1, %p33_p2  ;;  %p39_p5 = scmp.eq.s32.totalorder %s337_s0, 2 }
   0xf   : > { %p396_p6 = scmp.lt.s32.totalorder %s749_s15, 3  ;;  %s1069_s22 = sand.u32 1, %s745_s14  }
  0x10   : > { %p803_p7 = por %p39_p5, %p38_p3  ;;  %s340_s23 = sshll.u32 %s1069_s22, 3 }
  0x11   : > { %s811_s24 = sshll.u32 %s749_s15, 3  ;;  %s819_s29 = scalar_lea.vmem [#allocation5], %s340_s23 }
  0x12   : > { %s357_s25 = scalar_select %p396_p6, [#allocation4], [#allocation25] }
  0x13   : > { %s358_s26 = scalar_select %p396_p6, %s811_s24, 0 }
  0x14   : > { %s72_s27 = sadd.s32 1, %s811_s24  ;;  %s68_s30 = sshll.u32 %s819_s29, 4  ;;  %s827_s30 = int_to_ptr.vmem [resolvable:$true] %s68_s30 }
  0x15   : > { %s57_s28 = sld [smem:[%s357_s25 + %s358_s26]]  ;;  %s1078_s27 = smov (!%p396_p6, %s72_s27), 0 }
  0x16   : > { %s360_s3 = scalar_select %p396_p6, [#allocation4], [#allocation26] }
  0x17   : > { %s75_s4 = scalar_lea.vmem %s819_s29, 1 [#allocation5]  ;;  %s90_s12 = sadd.s32 2, %s811_s24 }
  0x18   : > { %s73_s5 = sld [smem:[%s360_s3 + %s1078_s27]]  ;;  %s836_s10 = sshll.u32 %s75_s4, 4  ;;  %s87_s10 = int_to_ptr.vmem [resolvable:$true] %s836_s10 }
  0x19   : > { %s831_s6 = scalar_select %p396_p6, [#allocation4], [#allocation27] }
  0x1a   : > { %s93_s0 = scalar_lea.vmem %s819_s29, 2 [#allocation5]  ;;  %s845_s26 = scalar_lea.hbm %s1067_s1, 16 }
  0x1b   : > { %s58_s9 = scalar_lea.hbm %s1067_s1, %s57_s28 }
  0x1c   : > { %s66_s11 = sshll.u32 %s58_s9, 4  ;;  %s67_s11 = int_to_ptr.hbm [resolvable:$true] %s66_s11 }
  0x1d   : > { %s435_s17 = sshra.s32 %s67_s11, 4  ;;  %s436_s17 = int_to_ptr.hbm [resolvable:$true] %s435_s17 }
  0x1e   : > { %s437_s18 = scalar_lea.hbm %s436_s17, 1  ;;  %p442_p11 = scmp.lt.s32.totalorder %s436_s17, %s1067_s1 }
  0x1f   : > { %p438_p8 = scmp.ne.s32.totalorder %s436_s17, %s437_s18  ;;  %p443_p12 = scmp.lt.s32.totalorder %s845_s26, %s437_s18 }
  0x21   : > { %p439_p9 = pnand %p438_p8, %p396_p6  ;;  %p444_p13 = por %p443_p12, %p442_p11 }
  0x23   : > { %p440_p10 = pneg %p439_p9 }
  0x25   : > { %p445_p0 = pnand %p444_p13, %p440_p10 }
  0x27   : > { %448 = shalt.err (!%p445_p0)  }
  0x28   : > { %359 = dma.hbm_to_vmem [thread:$0]  (%p396_p6), %s67_s11, 16, %s827_s30, [#allocation2] }
  0x29   : > { %s74_s7 = scalar_lea.hbm %s1067_s1, %s73_s5  ;;  %s858_s9 = sshll.u32 %s93_s0, 4  ;;  %s105_s9 = int_to_ptr.vmem [resolvable:$true] %s858_s9 }
  0x2a   : > { %s84_s8 = sshll.u32 %s74_s7, 4  ;;  %s108_s17 = sadd.s32 3, %s811_s24  ;;  %s85_s8 = int_to_ptr.hbm [resolvable:$true] %s84_s8 }
  0x2b   : > { %s463_s18 = sshra.s32 %s85_s8, 4  ;;  %s464_s18 = int_to_ptr.hbm [resolvable:$true] %s463_s18 }
  0x2c   : > { %s465_s23 = scalar_lea.hbm %s464_s18, 1  ;;  %p470_p5 = scmp.lt.s32.totalorder %s464_s18, %s1067_s1 }
  0x2d   : > { %p466_p1 = scmp.ne.s32.totalorder %s464_s18, %s465_s23  ;;  %p471_p8 = scmp.lt.s32.totalorder %s845_s26, %s465_s23 }
  0x2f   : > { %p467_p2 = pnand %p466_p1, %p396_p6  ;;  %p472_p9 = por %p471_p8, %p470_p5 }
  0x31   : > { %p468_p3 = pneg %p467_p2 }
  0x33   : > { %p473_p10 = pnand %p472_p9, %p468_p3 }
  0x35   : > { %476 = shalt.err (!%p473_p10)  }
  0x36   : > { %362 = dma.hbm_to_vmem [thread:$0]  (%p396_p6), %s85_s8, 16, %s87_s10, [#allocation2 + $0x1] }
  0x37   : > { %s1080_s12 = smov (!%p396_p6, %s90_s12), 0  ;;  %s1082_s17 = smov (!%p396_p6, %s108_s17), 0 }
  0x38   : > { %s366_s5 = scalar_select %p396_p6, [#allocation4], [#allocation28] }
  0x39   : > { %s91_s11 = sld [smem:[%s831_s6 + %s1080_s12]]  ;;  %s111_s0 = scalar_lea.vmem %s819_s29, 3 [#allocation5] }
  0x3a   : > { %s126_s28 = sadd.s32 4, %s811_s24  ;;  %s109_s3 = sld [smem:[%s366_s5 + %s1082_s17]] }
  0x3b   : > { %s129_s4 = scalar_lea.vmem %s819_s29, 4 [#allocation5]  ;;  %s1084_s28 = smov (!%p396_p6, %s126_s28), 0 }
  0x3c   : > { %s369_s7 = scalar_select %p396_p6, [#allocation4], [#allocation29] }
  0x3d   : > { %s889_s23 = sshll.u32 %s111_s0, 4  ;;  %s893_s25 = sshll.u32 %s129_s4, 4  ;;  %s123_s23 = int_to_ptr.vmem [resolvable:$true] %s889_s23  ;;  %s141_s25 = int_to_ptr.vmem [resolvable:$true] %s893_s25 }
  0x3e   : > { %s891_s12 = sld [smem:[%s369_s7 + %s1084_s28]] }
  0x3f   : > { %s92_s18 = scalar_lea.hbm %s1067_s1, %s91_s11 }
  0x40   : > { %s102_s6 = sshll.u32 %s92_s18, 4  ;;  %s103_s6 = int_to_ptr.hbm [resolvable:$true] %s102_s6 }
  0x41   : > { %s491_s27 = sshra.s32 %s103_s6, 4  ;;  %s492_s27 = int_to_ptr.hbm [resolvable:$true] %s491_s27 }
  0x42   : > { %s493_s17 = scalar_lea.hbm %s492_s27, 1  ;;  %p498_p0 = scmp.lt.s32.totalorder %s492_s27, %s1067_s1 }
  0x43   : > { %p494_p11 = scmp.ne.s32.totalorder %s492_s27, %s493_s17  ;;  %p499_p1 = scmp.lt.s32.totalorder %s845_s26, %s493_s17 }
  0x45   : > { %p495_p12 = pnand %p494_p11, %p396_p6  ;;  %p500_p2 = por %p499_p1, %p498_p0 }
  0x47   : > { %p496_p13 = pneg %p495_p12 }
  0x49   : > { %p501_p3 = pnand %p500_p2, %p496_p13 }
  0x4b   : > { %504 = shalt.err (!%p501_p3)  }
  0x4c   : > { %365 = dma.hbm_to_vmem [thread:$0]  (%p396_p6), %s103_s6, 16, %s105_s9, [#allocation2 + $0x2] }
  0x4d   : > { %s110_s28 = scalar_lea.hbm %s1067_s1, %s109_s3  ;;  %s147_s22 = scalar_lea.vmem %s819_s29, 5 [#allocation5] }
  0x4e   : > { %s120_s4 = sshll.u32 %s110_s28, 4  ;;  %s121_s4 = int_to_ptr.hbm [resolvable:$true] %s120_s4 }
  0x4f   : > { %s519_s7 = sshra.s32 %s121_s4, 4  ;;  %s520_s7 = int_to_ptr.hbm [resolvable:$true] %s519_s7 }
  0x50   : > { %s521_s10 = scalar_lea.hbm %s520_s7, 1  ;;  %p526_p10 = scmp.lt.s32.totalorder %s520_s7, %s1067_s1 }
  0x51   : > { %p522_p5 = scmp.ne.s32.totalorder %s520_s7, %s521_s10  ;;  %p527_p11 = scmp.lt.s32.totalorder %s845_s26, %s521_s10 }
  0x53   : > { %p523_p8 = pnand %p522_p5, %p396_p6  ;;  %p528_p12 = por %p527_p11, %p526_p10 }
  0x55   : > { %p524_p9 = pneg %p523_p8 }
  0x57   : > { %p529_p13 = pnand %p528_p12, %p524_p9 }
  0x59   : > { %532 = shalt.err (!%p529_p13)  }
  0x5a   : > { %368 = dma.hbm_to_vmem [thread:$0]  (%p396_p6), %s121_s4, 16, %s123_s23, [#allocation2 + $0x3] }
  0x5b   : > { %s128_s6 = scalar_lea.hbm %s1067_s1, %s891_s12  ;;  %s144_s27 = sadd.s32 5, %s811_s24 }
  0x5c   : > { %s138_s17 = sshll.u32 %s128_s6, 4  ;;  %s922_s5 = sshll.u32 %s147_s22, 4  ;;  %s139_s17 = int_to_ptr.hbm [resolvable:$true] %s138_s17  ;;  %s159_s5 = int_to_ptr.vmem [resolvable:$true] %s922_s5 }
  0x5d   : > { %s162_s11 = sadd.s32 6, %s811_s24  ;;  %s547_s0 = sshra.s32 %s139_s17, 4  ;;  %s548_s0 = int_to_ptr.hbm [resolvable:$true] %s547_s0 }
  0x5e   : > { %s549_s28 = scalar_lea.hbm %s548_s0, 1  ;;  %p554_p3 = scmp.lt.s32.totalorder %s548_s0, %s1067_s1 }
  0x5f   : > { %p550_p0 = scmp.ne.s32.totalorder %s548_s0, %s549_s28  ;;  %p555_p5 = scmp.lt.s32.totalorder %s845_s26, %s549_s28 }
  0x61   : > { %p551_p1 = pnand %p550_p0, %p396_p6  ;;  %p556_p8 = por %p555_p5, %p554_p3 }
  0x63   : > { %p552_p2 = pneg %p551_p1 }
  0x65   : > { %p557_p9 = pnand %p556_p8, %p552_p2 }
  0x67   : > { %560 = shalt.err (!%p557_p9)  }
  0x68   : > { %371 = dma.hbm_to_vmem [thread:$0]  (%p396_p6), %s139_s17, 16, %s141_s25, [#allocation2 + $0x4] }
  0x69   : > { %s372_s23 = scalar_select %p396_p6, [#allocation4], [#allocation30] }
  0x6a   : > { %s1086_s27 = smov (!%p396_p6, %s144_s27), 0  ;;  %s1088_s11 = smov (!%p396_p6, %s162_s11), 0 }
  0x6b   : > { %s375_s12 = scalar_select %p396_p6, [#allocation4], [#allocation31] }
  0x6c   : > { %s145_s4 = sld [smem:[%s372_s23 + %s1086_s27]]  ;;  %s180_s22 = sadd.s32 7, %s811_s24 }
  0x6d   : > { %s163_s8 = sld [smem:[%s375_s12 + %s1088_s11]]  ;;  %s165_s18 = scalar_lea.vmem %s819_s29, 6 [#allocation5] }
  0x6e   : > { %s378_s9 = scalar_select %p396_p6, [#allocation4], [#allocation32] }
  0x6f   : > { %s1090_s22 = smov (!%p396_p6, %s180_s22), 0  ;;  %s953_s17 = sshll.u32 %s165_s18, 4  ;;  %s177_s17 = int_to_ptr.vmem [resolvable:$true] %s953_s17 }
  0x70   : > { %s955_s27 = sld [smem:[%s378_s9 + %s1090_s22]]  ;;  %s183_s28 = scalar_lea.vmem %s819_s29, 7 [#allocation5] }
  0x72   : > { %s146_s6 = scalar_lea.hbm %s1067_s1, %s145_s4 }
  0x73   : > { %s156_s0 = sshll.u32 %s146_s6, 4  ;;  %s157_s0 = int_to_ptr.hbm [resolvable:$true] %s156_s0 }
  0x74   : > { %s575_s7 = sshra.s32 %s157_s0, 4  ;;  %s576_s7 = int_to_ptr.hbm [resolvable:$true] %s575_s7 }
  0x75   : > { %s577_s11 = scalar_lea.hbm %s576_s7, 1  ;;  %p582_p13 = scmp.lt.s32.totalorder %s576_s7, %s1067_s1 }
  0x76   : > { %p578_p10 = scmp.ne.s32.totalorder %s576_s7, %s577_s11  ;;  %p583_p0 = scmp.lt.s32.totalorder %s845_s26, %s577_s11 }
  0x78   : > { %p579_p11 = pnand %p578_p10, %p396_p6  ;;  %p584_p1 = por %p583_p0, %p582_p13 }
  0x7a   : > { %p580_p12 = pneg %p579_p11 }
  0x7c   : > { %p585_p2 = pnand %p584_p1, %p580_p12 }
  0x7e   : > { %588 = shalt.err (!%p585_p2)  }
  0x7f   : > { %374 = dma.hbm_to_vmem [thread:$0]  (%p396_p6), %s157_s0, 16, %s159_s5, [#allocation2 + $0x5] }
  0x80   : > { %s164_s4 = scalar_lea.hbm %s1067_s1, %s163_s8  ;;  %s970_s18 = sshll.u32 %s183_s28, 4  ;;  %s195_s18 = int_to_ptr.vmem [resolvable:$true] %s970_s18 }
  0x81   : > { %s174_s22 = sshll.u32 %s164_s4, 4  ;;  %s175_s22 = int_to_ptr.hbm [resolvable:$true] %s174_s22 }
  0x82   : > { %s603_s9 = sshra.s32 %s175_s22, 4  ;;  %s604_s9 = int_to_ptr.hbm [resolvable:$true] %s603_s9 }
  0x83   : > { %s605_s25 = scalar_lea.hbm %s604_s9, 1  ;;  %p610_p9 = scmp.lt.s32.totalorder %s604_s9, %s1067_s1 }
  0x84   : > { %p606_p3 = scmp.ne.s32.totalorder %s604_s9, %s605_s25  ;;  %p611_p10 = scmp.lt.s32.totalorder %s845_s26, %s605_s25 }
  0x86   : > { %p607_p5 = pnand %p606_p3, %p396_p6  ;;  %p612_p11 = por %p611_p10, %p610_p9 }
  0x88   : > { %p608_p8 = pneg %p607_p5 }
  0x8a   : > { %p613_p12 = pnand %p612_p11, %p608_p8 }
  0x8c   : > { %616 = shalt.err (!%p613_p12)  }
  0x8d   : > { %377 = dma.hbm_to_vmem [thread:$0]  (%p396_p6), %s175_s22, 16, %s177_s17, [#allocation2 + $0x6] }
  0x8e   : > { %s182_s0 = scalar_lea.hbm %s1067_s1, %s955_s27 }
  0x8f   : > { %s192_s28 = sshll.u32 %s182_s0, 4  ;;  %s193_s28 = int_to_ptr.hbm [resolvable:$true] %s192_s28 }
  0x90   : > { %s631_s7 = sshra.s32 %s193_s28, 4  ;;  %s632_s7 = int_to_ptr.hbm [resolvable:$true] %s631_s7 }
  0x91   : > { %s633_s11 = scalar_lea.hbm %s632_s7, 1  ;;  %p638_p2 = scmp.lt.s32.totalorder %s632_s7, %s1067_s1 }
  0x92   : > { %p634_p13 = scmp.ne.s32.totalorder %s632_s7, %s633_s11  ;;  %p639_p3 = scmp.lt.s32.totalorder %s845_s26, %s633_s11 }
  0x94   : > { %p635_p0 = pnand %p634_p13, %p396_p6  ;;  %p640_p5 = por %p639_p3, %p638_p2 }
  0x96   : > { %p636_p1 = pneg %p635_p0 }
  0x98   : > { %p641_p8 = pnand %p640_p5, %p636_p1 }
  0x9a   : > { %644 = shalt.err (!%p641_p8)  }
  0x9b   : > { %380 = dma.hbm_to_vmem [thread:$0]  (%p396_p6), %s193_s28, 16, %s195_s18, [#allocation2 + $0x7] }
  0x9c   : > { %704 = dma.done.wait (%p396_p6), [#allocation2], 16 }
  0x9d   : > { %706 = vsyncadd (%p396_p6), [#allocation2], 4294967280 }
  0x9e   : > { %708 = dma.done.wait (%p396_p6), [#allocation2 + $0x1], 16 }
  0x9f   : > { %710 = vsyncadd (%p396_p6), [#allocation2 + $0x1], 4294967280 }
  0xa0   : > { %712 = dma.done.wait (%p396_p6), [#allocation2 + $0x2], 16 }
  0xa1   : > { %714 = vsyncadd (%p396_p6), [#allocation2 + $0x2], 4294967280 }
  0xa2   : > { %716 = dma.done.wait (%p396_p6), [#allocation2 + $0x3], 16 }
  0xa3   : > { %718 = vsyncadd (%p396_p6), [#allocation2 + $0x3], 4294967280 }
  0xa4   : > { %720 = dma.done.wait (%p396_p6), [#allocation2 + $0x4], 16 }
  0xa5   : > { %722 = vsyncadd (%p396_p6), [#allocation2 + $0x4], 4294967280 }
  0xa6   : > { %724 = dma.done.wait (%p396_p6), [#allocation2 + $0x5], 16 }
  0xa7   : > { %726 = vsyncadd (%p396_p6), [#allocation2 + $0x5], 4294967280 }
  0xa8   : > { %728 = dma.done.wait (%p396_p6), [#allocation2 + $0x6], 16 }
  0xa9   : > { %730 = vsyncadd (%p396_p6), [#allocation2 + $0x6], 4294967280 }
  0xaa   : > { %732 = dma.done.wait (%p396_p6), [#allocation2 + $0x7], 16 }
  0xab   : > { %734 = vsyncadd (%p396_p6), [#allocation2 + $0x7], 4294967280  ;;  %s226_s27 = scalar_lea.hbm %s1068_s2, %s811_s24  ;;  %p1033_p9 = pnand %p396_p6, %p798_p4 }
  0xac   : > { %s230_s29 = sshll.u32 %s226_s27, 4  ;;  %p397_p10 = scmp.ge.s32.totalorder %s749_s15, 1  ;;  %s231_s29 = int_to_ptr.hbm [resolvable:$true] %s230_s29 }
  0xad   : > { %s1073_s4 = sand.u32 1, %s745_s14   ;;  %p663_p11 = pneg %p1033_p9 }
  0xae   : > { %s216_s22 = scalar_lea.sflag [#allocation6], %s1073_s4  ;;  %s674_s18 = sshra.s32 %s231_s29, 4  ;;  %s675_s18 = int_to_ptr.hbm [resolvable:$true] %s674_s18 }
  0xaf   : > { %s676_s9 = scalar_lea.hbm %s675_s18, 8  ;;  %s681_s25 = scalar_lea.hbm %s1068_s2, 24 }
  0xb0   : > { %p677_p12 = scmp.ne.s32.totalorder %s675_s18, %s676_s9  ;;  %p682_p4 = scmp.lt.s32.totalorder %s675_s18, %s1068_s2 }
  0xb1   : > { %p683_p6 = scmp.lt.s32.totalorder %s681_s25, %s676_s9 }
  0xb2   : > { %p679_p13 = pnand %p677_p12, %p663_p11 }
  0xb3   : > { %p684_p1 = por %p683_p6, %p682_p4 }
  0xb4   : > { %p680_p0 = pneg %p679_p13 }
  0xb6   : > { %p685_p2 = pnand %p684_p1, %p680_p0 }
  0xb8   : > { %688 = shalt.err (!%p685_p2)
}
  0xb9   : > { %391 = dma.vmem_to_hbm [thread:$0]  (!%p1033_p9), %s827_s30, 128, %s231_s29, %s216_s22  }
  0xba   : > { %s242_s5 = sand.u32 1, %s741_s13   ;;  %p393_p3 = pnand %p397_p10, %p803_p7 }
  0xbb   : > { %s243_s8 = scalar_lea.sflag [#allocation6], %s242_s5 }
  0xbc   : > { %p394_p5 = pneg %p393_p3 }
  0xbe   : > { %736 = dma.done.wait (%p394_p5), %s243_s8, 128  }
  0xbf   : > { %738 = vsyncadd (%p394_p5), %s243_s8, 4294967168  ;;  %p20_p8 = scmp.ge.s32.totalorder %s787_s16, 4   ;;  %s1074_s13 = smov %s745_s14 }
  0xc0   : > { %s1075_s14 = smov %s796_s19  ;;  %s1076_s15 = smov %s787_s16 }
  0xc1   :  { %22 = sbr.rel (!%p20_p8) target bundleno = 9 (0x9), region = 105 }
  0xc6   :  { %249 = vsyncpa [#allocation6], 1 }
  0xc7   :  { %251 = vsyncpa [#allocation6 + $0x1], 1 }
  0xc8   :  { %252 = vsyncmov [#allocation2] }
  0xcb   :  { %s253_s15 = vpop.sfrf %252 }
  0xcc   :  { %p346_p7 = scmp.ne.s32.totalorder %s253_s15, 0 }
  0xce   :  { %257 = shalt.err (%p346_p7)  }
  0xcf   :  { %259 = vsyncmov [#allocation2 + $0x1] }
  0xd2   :  { %s260_s21 = vpop.sfrf %259 }
  0xd3   :  { %p347_p9 = scmp.ne.s32.totalorder %s260_s21, 0 }
  0xd5   :  { %264 = shalt.err (%p347_p9)  }
  0xd6   :  { %266 = vsyncmov [#allocation2 + $0x2] }
  0xd9   :  { %s267_s30 = vpop.sfrf %266 }
  0xda   :  { %p348_p10 = scmp.ne.s32.totalorder %s267_s30, 0 }
  0xdc   :  { %271 = shalt.err (%p348_p10)  }
  0xdd   :  { %273 = vsyncmov [#allocation2 + $0x3] }
  0xe0   :  { %s274_s0 = vpop.sfrf %273 }
  0xe1   :  { %p349_p11 = scmp.ne.s32.totalorder %s274_s0, 0 }
  0xe3   :  { %278 = shalt.err (%p349_p11)  }
  0xe4   :  { %280 = vsyncmov [#allocation2 + $0x4] }
  0xe7   :  { %s281_s16 = vpop.sfrf %280 }
  0xe8   :  { %p350_p12 = scmp.ne.s32.totalorder %s281_s16, 0 }
  0xea   :  { %285 = shalt.err (%p350_p12)  }
  0xeb   :  { %287 = vsyncmov [#allocation2 + $0x5] }
  0xee   :  { %s288_s1 = vpop.sfrf %287 }
  0xef   :  { %p351_p13 = scmp.ne.s32.totalorder %s288_s1, 0 }
  0xf1   :  { %292 = shalt.err (%p351_p13)  }
  0xf2   :  { %294 = vsyncmov [#allocation2 + $0x6] }
  0xf5   :  { %s295_s2 = vpop.sfrf %294 }
  0xf6   :  { %p352_p0 = scmp.ne.s32.totalorder %s295_s2, 0 }
  0xf8   :  { %299 = shalt.err (%p352_p0)  }
  0xf9   :  { %301 = vsyncmov [#allocation2 + $0x7] }
  0xfc   :  { %s302_s13 = vpop.sfrf %301 }
  0xfd   :  { %p353_p4 = scmp.ne.s32.totalorder %s302_s13, 0 }
  0xff   :  { %306 = shalt.err (%p353_p4)  }

</bundles_post_ra>
